<compile_context>
chip_gen: v6e
topology: v6e:2x2x1
jax: 0.10.0
libtpu: 0.0.40
codegen_flags: <defaults>
</compile_context>

<pallas_src>
import math
import functools

import jax
import jax.numpy as jnp
from jax import lax
from jax.experimental import pallas as pl
from jax.experimental.pallas import tpu as pltpu


def _round_up(x, m):
    return (x + m - 1) // m * m


# --------------------------------------------------------------------------
# Pass 1: conv (im2col GEMM) + bias + GELU (+ rezero) + per-tile BN partials.
# --------------------------------------------------------------------------
def _conv_gelu_stats_kernel(*refs, tile_m, m_real, rezero):
    if rezero:
        p_ref, xc_ref, rw_ref, w_ref, b_ref, y_ref, st_ref = refs
    else:
        p_ref, w_ref, b_ref, y_ref, st_ref = refs
        xc_ref = rw_ref = None

    # One fat MXU matmul per tile, f32 accumulation.
    acc = jnp.dot(p_ref[...], w_ref[...], preferred_element_type=jnp.float32)
    acc = acc + b_ref[...].astype(jnp.float32)

    # Exact GELU (matches torch.nn.GELU default): 0.5*x*(1+erf(x/sqrt(2)))
    y = 0.5 * acc * (1.0 + lax.erf(acc * (1.0 / math.sqrt(2.0))))

    if rezero:
        rw = rw_ref[0, 0]  # scalar from SMEM
        y = xc_ref[...].astype(jnp.float32) + rw * y

    # Dropout2d: identity (inference semantics).

    # Per-tile partial BatchNorm statistics; mask off rows that only exist
    # because M was padded up to a multiple of TILE_M (keeps stats global-exact).
    row = lax.broadcasted_iota(jnp.int32, (tile_m, 1), 0) + pl.program_id(0) * tile_m
    valid = (row < m_real).astype(jnp.float32)              # (TILE_M, 1)
    ym = y * valid
    st_ref[0:1, :] = jnp.sum(ym, axis=0, keepdims=True)      # partial sum
    st_ref[1:2, :] = jnp.sum(ym * ym, axis=0, keepdims=True)  # partial sum of squares

    y_ref[...] = y.astype(y_ref.dtype)


# --------------------------------------------------------------------------
# Pass 2: apply global BatchNorm (y * scale + shift), lane-dense stores.
# --------------------------------------------------------------------------
def _bn_apply_kernel(y_ref, scale_ref, shift_ref, o_ref):
    o_ref[...] = (y_ref[...] * scale_ref[...] + shift_ref[...]).astype(o_ref.dtype)


# --------------------------------------------------------------------------
# Wrapper
# --------------------------------------------------------------------------
def conv_block_forward(x, w, b, resweight, *, padding=1, rezero=False,
                       tile_m=512, eps=1e-5):
    """Forward pass of convBlock.

    x: (N, C_in, H, W)   (NCHW, PyTorch convention)
    w: (C_out, C_in, 3, 3)
    b: (C_out,)
    resweight: scalar
    returns: (N, C_out, Ho, Wo)
    """
    N, C_in, H, W = x.shape
    C_out, C_in_w, K, K2 = w.shape
    assert C_in_w == C_in and K == K2 == 3
    Ho = H + 2 * padding - K + 1
    Wo = W + 2 * padding - K + 1
    M = N * Ho * Wo

    C_out_p = _round_up(C_out, 128)                     # lane-dense output width
    tile_m = _round_up(min(tile_m, _round_up(M, 8)), 8)
    M_pad = _round_up(M, tile_m)
    num_tiles = M_pad // tile_m
    Kdim = K * K * C_in

    # ---- layout plumbing in XLA: NCHW->NHWC, spatial pad, im2col, channel pad ----
    x_nhwc = jnp.transpose(x, (0, 2, 3, 1))
    xpad = jnp.pad(x_nhwc, ((0, 0), (padding, padding), (padding, padding), (0, 0)))
    taps = [xpad[:, dy:dy + Ho, dx:dx + Wo, :] for dy in range(K) for dx in range(K)]
    patches = jnp.concatenate(taps, axis=-1).reshape(M, Kdim)
    patches = jnp.pad(patches, ((0, M_pad - M), (0, 0)))

    # (Cout, Cin, K, K) -> (K*K*Cin, Cout_p), row order matches tap order above.
    w_r = jnp.transpose(w, (2, 3, 1, 0)).reshape(Kdim, C_out)
    w_r = jnp.pad(w_r, ((0, 0), (0, C_out_p - C_out)))
    b_r = jnp.pad(b.reshape(1, C_out), ((0, 0), (0, C_out_p - C_out)))

    cparams = pltpu.CompilerParams(
        dimension_semantics=("parallel",),        # shards tiles across TCs on v7x
        vmem_limit_bytes=48 * 1024 * 1024,
    )

    patch_spec = pl.BlockSpec((tile_m, Kdim), lambda i: (i, 0))
    row_spec = pl.BlockSpec((tile_m, C_out_p), lambda i: (i, 0))
    w_spec = pl.BlockSpec((Kdim, C_out_p), lambda i: (0, 0))
    vec_spec = pl.BlockSpec((1, C_out_p), lambda i: (0, 0))
    stats_spec = pl.BlockSpec((8, C_out_p), lambda i: (i, 0))

    inputs = [patches]
    in_specs = [patch_spec]
    if rezero:
        assert C_in == C_out, "rezero requires in_channels == out_channels"
        assert Ho == H and Wo == W, "rezero requires output spatial dims == input"
        xc = jnp.pad(x_nhwc.reshape(M, C_in),
                     ((0, M_pad - M), (0, C_out_p - C_in)))
        rw = jnp.asarray(resweight, jnp.float32).reshape(1, 1)
        inputs += [xc, rw]
        in_specs += [row_spec, pl.BlockSpec(memory_space=pltpu.MemorySpace.SMEM)]
    inputs += [w_r, b_r]
    in_specs += [w_spec, vec_spec]

    kernel1 = functools.partial(
        _conv_gelu_stats_kernel, tile_m=tile_m, m_real=M, rezero=rezero)

    y, stats = pl.pallas_call(
        kernel1,
        grid=(num_tiles,),
        in_specs=in_specs,
        out_specs=(row_spec, stats_spec),
        out_shape=(jax.ShapeDtypeStruct((M_pad, C_out_p), jnp.float32),
                   jax.ShapeDtypeStruct((num_tiles * 8, C_out_p), jnp.float32)),
        compiler_params=cparams,
    )(*inputs)

    # ---- finalize global batch statistics (tiny, XLA) ----
    stats = stats.reshape(num_tiles, 8, C_out_p)
    total = jnp.sum(stats[:, 0, :], axis=0)
    total_sq = jnp.sum(stats[:, 1, :], axis=0)
    mean = total / M
    var = jnp.maximum(total_sq / M - mean * mean, 0.0)    # biased variance
    inv = lax.rsqrt(var + eps)
    scale = inv.reshape(1, C_out_p)
    shift = (-mean * inv).reshape(1, C_out_p)

    out2d = pl.pallas_call(
        _bn_apply_kernel,
        grid=(num_tiles,),
        in_specs=[row_spec, vec_spec, vec_spec],
        out_specs=row_spec,
        out_shape=jax.ShapeDtypeStruct((M_pad, C_out_p), x.dtype),
        compiler_params=cparams,
    )(y, scale, shift)

    # Back to NCHW to match PyTorch (note: this transpose is a separate XLA pass;
    # keep NHWC downstream if the consumer allows — it is a free ~1.3-2x win).
    out = out2d[:M, :C_out].reshape(N, Ho, Wo, C_out)
    return jnp.transpose(out, (0, 3, 1, 2))


# --------------------------------------------------------------------------
# Parameter init mirroring the PyTorch module's __init__.
# --------------------------------------------------------------------------
def init_conv_block_params(key, in_channels, out_channels, k=3):
    k_w, k_b = jax.random.split(key)
    fan_in = in_channels * k * k
    std = math.sqrt(2.0 / fan_in)                     # kaiming_normal_, gain=sqrt(2)
    w = std * jax.random.normal(k_w, (out_channels, in_channels, k, k), jnp.float32)
    bound = 1.0 / math.sqrt(fan_in)                   # Conv2d default bias init
    b = jax.random.uniform(k_b, (out_channels,), jnp.float32, -bound, bound)
    resweight = jnp.zeros((), jnp.float32)            # nn.Parameter(torch.Tensor([0]))
    return w, b, resweight


# --------------------------------------------------------------------------
# Pure-JAX reference (for correctness check).
# --------------------------------------------------------------------------
def _reference_forward(x, w, b, resweight, *, padding=1, rezero=False, eps=1e-5):
    out = lax.conv_general_dilated(
        x, w, window_strides=(1, 1), padding=[(padding, padding)] * 2,
        dimension_numbers=("NCHW", "OIHW", "NCHW"))
    out = out + b.reshape(1, -1, 1, 1)
    out = 0.5 * out * (1.0 + lax.erf(out / math.sqrt(2.0)))
    if rezero:
        out = x + resweight * out
    mean = jnp.mean(out, axis=(0, 2, 3), keepdims=True)
    var = jnp.mean((out - mean) ** 2, axis=(0, 2, 3), keepdims=True)
    return (out - mean) * lax.rsqrt(var + eps)


if __name__ == "__main__":
    key = jax.random.PRNGKey(0)
    k1, k2, k3, k4 = jax.random.split(key, 4)

    # Test 1: plain block (rezero=False); tile_m=128 -> 4 grid tiles.
    N, C_in, C_out, H, W = 2, 4, 8, 16, 16
    x = jax.random.normal(k1, (N, C_in, H, W), jnp.float32)
    w, b, rw = init_conv_block_params(k2, C_in, C_out)
    out = conv_block_forward(x, w, b, rw, padding=1, rezero=False, tile_m=128)
    out = jax.block_until_ready(out)
    assert out.shape == (N, C_out, H, W), out.shape
    assert bool(jnp.all(jnp.isfinite(out)))
    ref = _reference_forward(x, w, b, rw, padding=1, rezero=False)
    err = float(jnp.max(jnp.abs(out - ref)))
    assert err < 2e-3, f"max abs err {err}"

    # Test 2: rezero path (Cin==Cout) + odd spatial size (exercises row-pad mask).
    N2, C2, H2, W2 = 2, 8, 15, 15
    x2 = jax.random.normal(k3, (N2, C2, H2, W2), jnp.float32)
    w2, b2, _ = init_conv_block_params(k4, C2, C2)
    rw2 = jnp.asarray(0.5, jnp.float32)
    out2 = conv_block_forward(x2, w2, b2, rw2, padding=1, rezero=True, tile_m=128)
    out2 = jax.block_until_ready(out2)
    assert out2.shape == (N2, C2, H2, W2), out2.shape
    assert bool(jnp.all(jnp.isfinite(out2)))
    ref2 = _reference_forward(x2, w2, b2, rw2, padding=1, rezero=True)
    err2 = float(jnp.max(jnp.abs(out2 - ref2)))
    assert err2 < 2e-3, f"max abs err {err2}"

    print("KERNEL_OK")
</pallas_src>

<mosaic_0001>
module attributes {stable_mosaic.version = 11 : i64} {
  func.func @_conv_gelu_stats_kernel(%arg0: i32, %arg1: memref<128x36xf32, #tpu.memory_space<vmem>>, %arg2: memref<36x128xf32, #tpu.memory_space<vmem>>, %arg3: memref<1x128xf32, #tpu.memory_space<vmem>>, %arg4: memref<128x128xf32, #tpu.memory_space<vmem>>, %arg5: memref<8x128xf32, #tpu.memory_space<vmem>>) attributes {dimension_semantics = [#tpu.dimension_semantics<parallel>], iteration_bounds = array<i64: 4>, scalar_prefetch = 0 : i64, scratch_operands = 0 : i64, tpu.core_type = #tpu.core_type<tc>, window_params = [{transform_indices = @transform_0, window_bounds = array<i64: 128, 36>}, {pipeline_mode = #tpu.pipeline_mode<synchronous>, transform_indices = @transform_1, window_bounds = array<i64: 36, 128>}, {pipeline_mode = #tpu.pipeline_mode<synchronous>, transform_indices = @transform_2, window_bounds = array<i64: 1, 128>}, {transform_indices = @transform_3, window_bounds = array<i64: 128, 128>}, {transform_indices = @transform_4, window_bounds = array<i64: 8, 128>}]} {
    %c0 = arith.constant 0 : index
    %c0_0 = arith.constant 0 : index
    %0 = vector.load %arg1[%c0, %c0_0] : memref<128x36xf32, #tpu.memory_space<vmem>>, vector<128x36xf32>
    %c0_1 = arith.constant 0 : index
    %c0_2 = arith.constant 0 : index
    %1 = vector.load %arg2[%c0_1, %c0_2] : memref<36x128xf32, #tpu.memory_space<vmem>>, vector<36x128xf32>
    %cst = arith.constant dense<0.000000e+00> : vector<128x128xf32>
    %2 = tpu.matmul %0, %1, %cst {dimension_numbers = #tpu.dot_dimension_numbers<[1], [0], [0], [1], [0, 0, 1, 1], [], []>} : vector<128x36xf32>, vector<36x128xf32>, vector<128x128xf32> -> vector<128x128xf32>
    %c0_3 = arith.constant 0 : index
    %c0_4 = arith.constant 0 : index
    %3 = vector.load %arg3[%c0_3, %c0_4] : memref<1x128xf32, #tpu.memory_space<vmem>>, vector<1x128xf32>
    %4 = vector.broadcast %3 : vector<1x128xf32> to vector<128x128xf32>
    %5 = arith.addf %2, %4 : vector<128x128xf32>
    %cst_5 = arith.constant 5.000000e-01 : f32
    %6 = vector.broadcast %cst_5 : f32 to vector<128x128xf32>
    %7 = arith.mulf %6, %5 : vector<128x128xf32>
    %cst_6 = arith.constant 0.707106769 : f32
    %8 = vector.broadcast %cst_6 : f32 to vector<128x128xf32>
    %9 = arith.mulf %5, %8 : vector<128x128xf32>
    %10 = math.erf %9 : vector<128x128xf32>
    %cst_7 = arith.constant 1.000000e+00 : f32
    %11 = vector.broadcast %cst_7 : f32 to vector<128x128xf32>
    %12 = arith.addf %11, %10 : vector<128x128xf32>
    %13 = arith.mulf %7, %12 : vector<128x128xf32>
    %14 = tpu.iota {dimensions = array<i32: 0>} : vector<128x1xi32>
    %c128_i32 = arith.constant 128 : i32
    %15 = arith.muli %arg0, %c128_i32 : i32
    %16 = vector.broadcast %15 : i32 to vector<128x1xi32>
    %17 = arith.addi %14, %16 : vector<128x1xi32>
    %c512_i32 = arith.constant 512 : i32
    %18 = vector.broadcast %c512_i32 : i32 to vector<128x1xi32>
    %19 = arith.cmpi slt, %17, %18 : vector<128x1xi32>
    %20 = arith.extui %19 : vector<128x1xi1> to vector<128x1xi32>
    %21 = arith.sitofp %20 : vector<128x1xi32> to vector<128x1xf32>
    %22 = vector.broadcast %21 : vector<128x1xf32> to vector<128x128xf32>
    %23 = arith.mulf %13, %22 : vector<128x128xf32>
    %cst_8 = arith.constant dense<0.000000e+00> : vector<128xf32>
    %24 = vector.multi_reduction <add>, %23, %cst_8 [0] : vector<128x128xf32> to vector<128xf32>
    %25 = vector.shape_cast %24 : vector<128xf32> to vector<1x128xf32>
    %c0_9 = arith.constant 0 : index
    %c0_10 = arith.constant 0 : index
    %26 = vector.load %arg5[%c0_9, %c0_10] : memref<8x128xf32, #tpu.memory_space<vmem>>, vector<1x128xf32>
    tpu.vector_store %arg5[%c0_9, %c0_10], %25 {strides = array<i32>} : memref<8x128xf32, #tpu.memory_space<vmem>>, vector<1x128xf32>,
    %27 = arith.mulf %23, %23 : vector<128x128xf32>
    %cst_11 = arith.constant dense<0.000000e+00> : vector<128xf32>
    %28 = vector.multi_reduction <add>, %27, %cst_11 [0] : vector<128x128xf32> to vector<128xf32>
    %29 = vector.shape_cast %28 : vector<128xf32> to vector<1x128xf32>
    %c1 = arith.constant 1 : index
    %c0_12 = arith.constant 0 : index
    %30 = vector.load %arg5[%c1, %c0_12] : memref<8x128xf32, #tpu.memory_space<vmem>>, vector<1x128xf32>
    tpu.vector_store %arg5[%c1, %c0_12], %29 {strides = array<i32>} : memref<8x128xf32, #tpu.memory_space<vmem>>, vector<1x128xf32>,
    %c0_13 = arith.constant 0 : index
    %c0_14 = arith.constant 0 : index
    %31 = vector.load %arg4[%c0_13, %c0_14] : memref<128x128xf32, #tpu.memory_space<vmem>>, vector<128x128xf32>
    tpu.vector_store %arg4[%c0_13, %c0_14], %13 {strides = array<i32>} : memref<128x128xf32, #tpu.memory_space<vmem>>, vector<128x128xf32>,
    return
  }
  func.func @transform_0(%arg0: i32) -> (i32, i32) {
    %c0_i32 = arith.constant 0 : i32
    %c0_i32_0 = arith.constant 0 : i32
    return %arg0, %c0_i32 : i32, i32
  }
  func.func @transform_1(%arg0: i32) -> (i32, i32) {
    %c0_i32 = arith.constant 0 : i32
    %c0_i32_0 = arith.constant 0 : i32
    %c0_i32_1 = arith.constant 0 : i32
    return %c0_i32, %c0_i32_0 : i32, i32
  }
  func.func @transform_2(%arg0: i32) -> (i32, i32) {
    %c0_i32 = arith.constant 0 : i32
    %c0_i32_0 = arith.constant 0 : i32
    %c0_i32_1 = arith.constant 0 : i32
    return %c0_i32, %c0_i32_0 : i32, i32
  }
  func.func @transform_3(%arg0: i32) -> (i32, i32) {
    %c0_i32 = arith.constant 0 : i32
    %c0_i32_0 = arith.constant 0 : i32
    return %arg0, %c0_i32 : i32, i32
  }
  func.func @transform_4(%arg0: i32) -> (i32, i32) {
    %c0_i32 = arith.constant 0 : i32
    %c0_i32_0 = arith.constant 0 : i32
    return %arg0, %c0_i32 : i32, i32
  }
}

</mosaic_0001>

<bundles_post_ra>
// kernel: tpu_custom_call.1
= control target key start
LH: loop header
LB: loop body
LE: loop exit
PB: predicated region body
PF: predicated region fallthrough
CT: control target
= control target key end

     0   :  { %10 = vsyncpa [#allocation3], 0  ;;  %s1549_s0 = inlined_call_operand.vmem [shape: f32[512,36], index: 0, kind: input, shape index: {}]   ;;  %s1550_s1 = inlined_call_operand.vmem [shape: f32[36,128], index: 1, kind: input, shape index: {}]   ;;  %s1551_s2 = inlined_call_operand.vmem [shape: f32[1,128], index: 2, kind: input, shape index: {}]   ;;  %s1552_s3 = inlined_call_operand.hbm [shape: f32[512,128], index: 3, kind: output, shape index: {0}]   ;;  %s1553_s4 = inlined_call_operand.hbm [shape: f32[32,128], index: 4, kind: output, shape index: {1}]  }
   0x1   :  { %12 = vsyncpa [#allocation3 + $0x1], 0 }
   0x2   :  { %13 = vsyncpa [#allocation5], 0 }
   0x3   :  { %15 = vsyncpa [#allocation5 + $0x1], 0  ;;  %s1134_s15 = smov 0   ;;  %s1136_s16 = smov 0  }
   0x4   :  { %s1138_s17 = smov 0   ;;  %s1140_s18 = smov 0  }
   0x5 LB: > { %s1155_s19 = sadd.s32 4294967295, %s1102_s18   ;;  %s817_s20 = sadd.s32 4294967294, %s1102_s18   ;;  %s1102_s18 = sphi %s1140_s18, %s1559_s18   ;;  %s1098_s17 = sphi %s1138_s17, %s1558_s17   ;;  %s1094_s16 = sphi %s1136_s16, %s1557_s16   ;;  %s1090_s15 = sphi %s1134_s15, %s1556_s15  }
   0x6   : > { %s1159_s21 = sadd.s32 1, %s1102_s18   ;;  %s96_s22 = sadd.s32 1, %s1098_s17 }
   0x7   : > { %s93_s23 = ssub.s32 %s1102_s18, %s1159_s21  ;;  %p106_p0 = scmp.ne.s32.totalorder %s1098_s17, %s1094_s16 }
   0x8   : > { %p94_p1 = scmp.eq.s32.totalorder %s93_s23, 0  ;;  %p107_p2 = scmp.eq.s32.totalorder %s1155_s19, 3 }
   0x9   : > { %p112_p3 = scmp.ne.s32.totalorder %s1094_s16, %s1090_s15  ;;  %p113_p4 = scmp.eq.s32.totalorder %s817_s20, 3 }
   0xa   : > { %s1170_s24 = scalar_select %p94_p1, %s1098_s17, %s96_s22  }
   0xb   : > { %p1172_p5 = por %p107_p2, %p106_p0  ;;  %p1176_p6 = por %p113_p4, %p112_p3 }
   0xc   : > { %p820_p7 = scmp.ge.s32.totalorder %s1102_s18, 1  ;;  %p172_p8 = scmp.lt.s32.totalorder %s1102_s18, 5 }
   0xe   : > { %p173_p9 = pnand %p820_p7, %p172_p8 }
   0xf   : > { %s823_s5 = sshll.u32 (!%p173_p9), %s1155_s19, 4  ;;  %s843_s22 = sshll.u32 (!%p173_p9), %s1155_s19, 7 }
  0x10   : > { %176 = sbr.rel (%p173_p9) target bundleno = 322 (0x142), region = 32  ;;  %p204_p10 = scmp.lt.s32.totalorder (!%p173_p9), %s823_s5, 63 }
  0x11   : > { %s1334_s28 = sand.u32 (!%p173_p9), 1, %s1094_s16   ;;  %s1105_s12 = smov (!%p173_p9), [#allocation2]  }
  0x12   : > { %s821_s29 = sshll.u32 (!%p173_p9), %s1334_s28, 7  ;;  %s1016_s13 = sshll.u32 (!%p173_p9), %s1105_s12, 4  ;;  %s1017_s13 = int_to_ptr.vmem [resolvable:$false] %s1016_s13 }
  0x13   : > { %s1375_s30 = scalar_lea.vmem (!%p173_p9), [#allocation2], %s821_s29  ;;  %s1018_s14 = scalar_lea.vmem (!%p173_p9), %s1017_s13, 4096 }
  0x14   : > { %s710_s6 = sshll.u32 (!%p173_p9), %s1375_s30, 4  ;;  %s1453_s6 = int_to_ptr.vmem [resolvable:$true] %s710_s6 }
  0x15   : > { %v230_v0 = vld [vmem:[%s1550_s1 + $0x20] sm:$0xf]  ;;  %vm287_vm0 = vcmask 1043456   ;;  %v229_v1 = vld [vmem:[%s1550_s1 + $0x18] sm:$0xff]  ;;  %v228_v2 = vld [vmem:[%s1550_s1 + $0x10] sm:$0xff]  ;;  %s1561_s5 = smov (!%p204_p10, %s823_s5), 63  ;;  %v516_v21 = vlaneseq  ;;  %v1241_v24 = vstv %s843_s22  ;;  %p1019_p0 = scmp.lt.s32.totalorder %s1453_s6, %s1017_s13 }
  0x16   : > { %889 = vmatprep.subr.msk.mxu0 %vm287_vm0, %v230_v0  ;;  %923 = vmatprep.subr.msk.mxu1 %vm287_vm0, %v230_v0  ;;  %v227_v3 = vld [vmem:[%s1550_s1 + $0x8] sm:$0xff]  ;;  %s824_s10 = sshll.u32 %s1561_s5, 3  ;;  %v226_v4 = vld [vmem:[%s1550_s1] sm:$0xff]  ;;  %vm238_vm1 = vcmask 293888   ;;  %v1104_v43 = vmov 0.0   ;;  %s867_s5 = sshll.u32 %s1155_s19, 11 }
  0x17   : > { %890 = vmatpush3.msk.msra.mxu0 %vm287_vm0, %v230_v0  ;;  %928 = vmatpush3.msk.msra.mxu1 %vm287_vm0, %v230_v0  ;;  %s1201_s20 = scalar_lea.vmem %s1549_s0, %s824_s10  ;;  %v1235_v22 = vshrl.u32 %v516_v21, 7  ;;  %v1250_v28 = vld [vmem:[%s1551_s2] ss:$0 sm:$0xff]  ;;  %s1451_s9 = scalar_lea.hbm %s1552_s3, %s867_s5 }
  0x18   : > { %891 = vmatprep.subr.mxu0 %v229_v1  ;;  %924 = vmatprep.subr.mxu1 %v229_v1  ;;  %v210_v5 = vld [vmem:[%s1201_s20] sm:$0xff]  ;;  %v211_v7 = vld [vmem:[%s1201_s20 + $0x8] sm:$0xff]  ;;  %v212_v9 = vld [vmem:[%s1201_s20 + $0x10] sm:$0xff]  ;;  %s692_s10 = scalar_lea.sflag [#allocation3], %s1334_s28  ;;  %s1012_s11 = scalar_lea.vmem %s1453_s6, 2048 }
  0x19   : > { %892 = vmatpush3.msra.mxu0 %v229_v1  ;;  %929 = vmatpush3.msra.mxu1 %v229_v1  ;;  %v218_v6 = vld [vmem:[%s1201_s20 + $0x40] sm:$0xff]  ;;  %v219_v8 = vld [vmem:[%s1201_s20 + $0x48] sm:$0xff]  ;;  %v220_v10 = vld [vmem:[%s1201_s20 + $0x50] sm:$0xff]  ;;  %v518_v23 = vadd.s32 8, %v1235_v22  ;;  %v525_v25 = vadd.s32 64, %v1235_v22  ;;  %v535_v27 = vadd.s32 %v1241_v24, %v1235_v22  ;;  %v526_v29 = vadd.s32 72, %v1235_v22  ;;  %p1013_p11 = scmp.ne.s32.totalorder %s1453_s6, %s1012_s11  ;;  %p1020_p1 = scmp.lt.s32.totalorder %s1018_s14, %s1012_s11 }
  0x1a   : > { %893 = vmatprep.subr.mxu0 %v228_v2  ;;  %925 = vmatprep.subr.mxu1 %v228_v2  ;;  %v213_v11 = vld [vmem:[%s1201_s20 + $0x18] sm:$0xff]  ;;  %v214_v13 = vld [vmem:[%s1201_s20 + $0x20] sm:$0xff]  ;;  %v215_v15 = vld [vmem:[%s1201_s20 + $0x28] sm:$0xff]  ;;  %v520_v31 = vadd.s32 24, %v1235_v22  ;;  %v528_v36 = vadd.s32 88, %v1235_v22  ;;  %v519_v56 = vadd.s32 16, %v1235_v22 }
  0x1b   : > { %894 = vmatpush3.msra.mxu0 %v228_v2  ;;  %930 = vmatpush3.msra.mxu1 %v228_v2  ;;  %v221_v12 = vld [vmem:[%s1201_s20 + $0x58] sm:$0xff]  ;;  %v222_v14 = vld [vmem:[%s1201_s20 + $0x60] sm:$0xff]  ;;  %v223_v16 = vld [vmem:[%s1201_s20 + $0x68] sm:$0xff]  ;;  %v536_v26 = vadd.s32 %v1241_v24, %v518_v23  ;;  %v543_v30 = vadd.s32 %v1241_v24, %v525_v25  ;;  %vm551_vm3 = vcmp.lt.s32.totalorder %v535_v27, 512  ;;  %v1263_v37 = vadd.s32 %v1241_v24, %v526_v29  ;;  %p1014_p12 = pnand %p1013_p11, %p1172_p5  ;;  %p1021_p2 = por %p1020_p1, %p1019_p0 }
  0x1c   : > { %895 = vmatprep.subr.mxu0 %v227_v3  ;;  %926 = vmatprep.subr.mxu1 %v227_v3  ;;  %v216_v17 = vld [vmem:[%s1201_s20 + $0x30] sm:$0xff]  ;;  %v217_v19 = vld [vmem:[%s1201_s20 + $0x38] sm:$0xff]  ;;  %v538_v42 = vadd.s32 %v1241_v24, %v520_v31  ;;  %v1275_v46 = vsel %vm551_vm3, 1.0, %v1104_v43  ;;  %v1287_v52 = vadd.s32 %v1241_v24, %v528_v36  ;;  %v522_v60 = vadd.s32 40, %v1235_v22 }
  0x1d   : > { %896 = vmatpush3.msra.mxu0 %v227_v3  ;;  %931 = vmatpush3.msra.mxu1 %v227_v3  ;;  %v224_v18 = vld [vmem:[%s1201_s20 + $0x70] sm:$0xff]  ;;  %v225_v20 = vld [vmem:[%s1201_s20 + $0x78] sm:$0xff]  ;;  %vm552_vm2 = vcmp.lt.s32.totalorder %v536_v26, 512  ;;  %vm559_vm4 = vcmp.lt.s32.totalorder %v543_v30, 512  ;;  %v527_v2 = vadd.s32 80, %v1235_v22  ;;  %v1340_v23 = vadd.s32 104, %v1235_v22  ;;  %p1015_p13 = pneg %p1014_p12 }
  0x1e   : > { %897 = vmatprep.subr.mxu0 %v226_v4  ;;  %927 = vmatprep.subr.mxu1 %v226_v4  ;;  %v1269_v44 = vsel %vm552_vm2, 1.0, %v1104_v43  ;;  %v1291_v54 = vsel %vm559_vm4, 1.0, %v1104_v43  ;;  %vm554_vm5 = vcmp.lt.s32.totalorder %v538_v42, 512  ;;  %v523_v42 = vadd.s32 48, %v1235_v22 }
  0x1f   : > { %898 = vmatpush3.msra.mxu0 %v226_v4  ;;  %932 = vmatpush3.msra.mxu1 %v226_v4  ;;  %v1337_v21 = vadd.s32 %v1241_v24, %v527_v2  ;;  %vm560_vm11 = vcmp.lt.s32.totalorder %v1263_v37, 512  ;;  %vm562_vm13 = vcmp.lt.s32.totalorder %v1287_v52, 512  ;;  %p1022_p3 = pnand %p1021_p2, %p1015_p13 }
  0x20   : > { %899 = vmatprep.mubr.msk.f32.mxu0 %vm238_vm1, %v210_v5  ;;  %911 = vmatprep.mubr.msk.f32.mxu1 %vm238_vm1, %v218_v6  ;;  %v1312_v5 = vsel %vm554_vm5, 1.0, %v1104_v43 }
  0x21   : > { %900 = vmatmul.mubr.msk.f32.vlgmr.msra.gmra.mxu0 %vm238_vm1, %v211_v7  ;;  %912 = vmatmul.mubr.msk.f32.vlgmr.msra.gmra.mxu1 %vm238_vm1, %v219_v8  ;;  %v537_v7 = vadd.s32 %v1241_v24, %v519_v56  ;;  %vm561_vm12 = vcmp.lt.s32.totalorder %v1337_v21, 512 }
  0x22   : > { %902 = vmatprep.mubr.msk.f32.mxu0 %vm238_vm1, %v212_v9  ;;  %914 = vmatprep.mubr.msk.f32.mxu1 %vm238_vm1, %v220_v10  ;;  %v854_v37 = vsel %vm561_vm12, 1.0, %v1104_v43 }
  0x23   : > { %vm553_vm6 = vcmp.lt.s32.totalorder %v537_v7, 512 }
  0x25   : > { %903 = vmatmul.mubr.msk.f32.gmra.mxu0 %vm238_vm1, %v213_v11  ;;  %915 = vmatmul.mubr.msk.f32.gmra.mxu1 %vm238_vm1, %v221_v12  ;;  %v540_v12 = vadd.s32 %v1241_v24, %v522_v60 }
  0x26   : > { %905 = vmatprep.mubr.msk.f32.mxu0 %vm238_vm1, %v214_v13  ;;  %917 = vmatprep.mubr.msk.f32.mxu1 %vm238_vm1, %v222_v14 }
  0x27   : > { %vm556_vm7 = vcmp.lt.s32.totalorder %v540_v12, 512 }
  0x29   : > { %906 = vmatmul.mubr.msk.f32.gmra.mxu0 %vm238_vm1, %v215_v15  ;;  %918 = vmatmul.mubr.msk.f32.gmra.mxu1 %vm238_vm1, %v223_v16  ;;  %v521_v15 = vadd.s32 32, %v1235_v22 }
  0x2a   : > { %908 = vmatprep.mubr.msk.f32.mxu0 %vm238_vm1, %v216_v17  ;;  %920 = vmatprep.mubr.msk.f32.mxu1 %vm238_vm1, %v224_v18 }
  0x2b   : > { %v539_v30 = vadd.s32 %v1241_v24, %v521_v15 }
  0x2d   : > { %909 = vmatmul.mubr.msk.f32.gmra.mxu0 %vm238_vm1, %v217_v19  ;;  %921 = vmatmul.mubr.msk.f32.gmra.mxu1 %vm238_vm1, %v225_v20  ;;  %vm555_vm8 = vcmp.lt.s32.totalorder %v539_v30, 512 }
  0xe1   : > { %v901_v32 = vpop.f32.mrf.mxu0  ;;  %v913_v33 = vpop.f32.mrf.mxu1 }
  0xe2   : > { %v1256_v34 = vadd.f32 %v901_v32, %v1250_v28  ;;  %v1259_v35 = vadd.f32 %v913_v33, %v1250_v28  ;;  %v524_v33 = vadd.s32 56, %v1235_v22 }
  0xe3   : > { %v357_v38 = vpop.f32.mrf.mxu0  ;;  %v397_v39 = vpop.f32.mrf.mxu1 }
  0xe4   : > { %v453_v40 = vmul.f32 0.70710677, %v1256_v34  ;;  %v461_v41 = vmul.f32 0.70710677, %v1259_v35  ;;  %v1272_v45 = vadd.f32 %v1250_v28, %v357_v38  ;;  %v1278_v47 = vadd.f32 %v1250_v28, %v397_v39 }
  0xe5   : > { %v904_v48 = vpop.f32.mrf.mxu0  ;;  %v916_v49 = vpop.f32.mrf.mxu1  ;;  %v1370_v60 = vadd.s32 %v1241_v24, %v524_v33 }
  0xe6   : > { %980 = verf.f32 %v453_v40  ;;  %v1281_v50 = vadd.f32 %v904_v48, %v1250_v28  ;;  %v1284_v51 = vadd.f32 %v916_v49, %v1250_v28  ;;  %v452_v53 = vmul.f32 0.70710677, %v1272_v45 }
  0xe7   : > { %982 = verf.f32 %v461_v41  ;;  %v367_v55 = vpop.f32.mrf.mxu0  ;;  %v407_v57 = vpop.f32.mrf.mxu1  ;;  %v460_v58 = vmul.f32 0.70710677, %v1278_v47  ;;  %v445_v40 = vmul.f32 0.5, %v1259_v35  ;;  %v1357_v41 = vadd.s32 96, %v1235_v22 }
  0xe8   : > { %v455_v59 = vmul.f32 0.70710677, %v1281_v50  ;;  %984 = verf.f32 %v452_v53  ;;  %v463_v61 = vmul.f32 0.70710677, %v1284_v51  ;;  %v1299_v62 = vadd.f32 %v1250_v28, %v367_v55 }
  0xe9   : > { %v1302_v63 = vadd.f32 %v1250_v28, %v407_v57  ;;  %v907_v0 = vpop.f32.mrf.mxu0  ;;  %v919_v1 = vpop.f32.mrf.mxu1  ;;  %986 = verf.f32 %v460_v58  ;;  %v437_v49 = vmul.f32 0.5, %v1256_v34  ;;  %v1366_v35 = vsel %vm556_vm7, 1.0, %v1104_v43 }
  0xea   : > { %v1306_v3 = vadd.f32 %v907_v0, %v1250_v28  ;;  %v1309_v4 = vadd.f32 %v919_v1, %v1250_v28  ;;  %988 = verf.f32 %v455_v59  ;;  %v454_v6 = vmul.f32 0.70710677, %v1299_v62 }
  0xeb   : > { %v377_v8 = vpop.f32.mrf.mxu0  ;;  %v417_v9 = vpop.f32.mrf.mxu1  ;;  %990 = verf.f32 %v463_v61  ;;  %v462_v10 = vmul.f32 0.70710677, %v1302_v63  ;;  %v436_v0 = vmul.f32 0.5, %v1272_v45  ;;  %vm558_vm9 = vcmp.lt.s32.totalorder %v1370_v60, 512 }
  0xec   : > { %v457_v11 = vmul.f32 0.70710677, %v1306_v3  ;;  %992 = verf.f32 %v454_v6  ;;  %v465_v13 = vmul.f32 0.70710677, %v1309_v4  ;;  %v1321_v14 = vadd.f32 %v1250_v28, %v377_v8 }
  0xed   : > { %v910_v16 = vpop.f32.mrf.mxu0  ;;  %v922_v17 = vpop.f32.mrf.mxu1  ;;  %994 = verf.f32 %v462_v10  ;;  %v1325_v18 = vadd.f32 %v1250_v28, %v417_v9  ;;  %v444_v6 = vmul.f32 0.5, %v1278_v47  ;;  %v447_v8 = vmul.f32 0.5, %v1284_v51 }
  0xee   : > { %v1328_v19 = vadd.f32 %v910_v16, %v1250_v28  ;;  %v1331_v20 = vadd.f32 %v922_v17, %v1250_v28  ;;  %996 = verf.f32 %v457_v11  ;;  %v456_v25 = vmul.f32 0.70710677, %v1321_v14 }
  0xef   : > { %v387_v26 = vpop.f32.mrf.mxu0  ;;  %v427_v27 = vpop.f32.mrf.mxu1  ;;  %998 = verf.f32 %v465_v13  ;;  %v464_v29 = vmul.f32 0.70710677, %v1325_v18  ;;  %v1381_v9 = vadd.s32 %v1241_v24, %v523_v42  ;;  %v439_v11 = vmul.f32 0.5, %v1281_v50 }
  0xf0   : > { %1000 = verf.f32 %v456_v25  ;;  %v459_v31 = vmul.f32 0.70710677, %v1328_v19  ;;  %v467_v32 = vmul.f32 0.70710677, %v1331_v20  ;;  %v1350_v36 = vadd.f32 %v1250_v28, %v387_v26 }
  0xf1   : > { %1002 = verf.f32 %v464_v29  ;;  %v1353_v38 = vadd.f32 %v1250_v28, %v427_v27  ;;  %v846_v28 = vsel %vm553_vm6, 1.0, %v1104_v43  ;;  %v848_v13 = vsel %vm555_vm8, 1.0, %v1104_v43 }
  0xf2   : > { %1004 = verf.f32 %v459_v31  ;;  %v458_v55 = vmul.f32 0.70710677, %v1350_v36  ;;  %v438_v50 = vmul.f32 0.5, %v1299_v62  ;;  %vm557_vm10 = vcmp.lt.s32.totalorder %v1381_v9, 512 }
  0xf3   : > { %v981_v39 = vpop.eup %980  ;;  %1006 = verf.f32 %v467_v32  ;;  %v466_v57 = vmul.f32 0.70710677, %v1353_v38  ;;  %v449_v62 = vmul.f32 0.5, %v1309_v4  ;;  %v1442_v60 = vadd.s32 %v1241_v24, %v1357_v41 }
  0xf4   : > { %v983_v48 = vpop.eup %982  ;;  %v485_v53 = vadd.f32 1.0, %v981_v39  ;;  %1008 = verf.f32 %v458_v55  ;;  %v441_v39 = vmul.f32 0.5, %v1306_v3 }
  0xf5   : > { %v493_v56 = vadd.f32 1.0, %v983_v48  ;;  %v985_v58 = vpop.eup %984  ;;  %1010 = verf.f32 %v466_v57  ;;  %vm563_vm14 = vcmp.lt.s32.totalorder %v1442_v60, 512 }
  0xf6   : > { %v501_v59 = vmul.f32 %v485_v53, %v437_v49  ;;  %v987_v34 = vpop.eup %986  ;;  %v484_v1 = vadd.f32 1.0, %v985_v58  ;;  %v440_v49 = vmul.f32 0.5, %v1321_v14 }
  0xf7   : > { %v1372_v61 = vmul.f32 %v493_v56, %v445_v40  ;;  %v989_v2 = vpop.eup %988  ;;  %v492_v7 = vadd.f32 1.0, %v987_v34 }
  0xf8   : > { %676 = vst [vmem:[%s1375_s30 + $0x8] sm:$0xff] %v501_v59  ;;  %v991_v10 = vpop.eup %990  ;;  %v500_v45 = vmul.f32 %v484_v1, %v436_v0  ;;  %v487_v12 = vadd.f32 1.0, %v989_v2  ;;  %v600_v47 = vmul.f32 %v1269_v44, %v501_v59  ;;  %v446_v44 = vmul.f32 0.5, %v1302_v63 }
  0xf9   : > { %684 = vst [vmem:[%s1375_s30 + $0x48] sm:$0xff] %v1372_v61  ;;  %v993_v15 = vpop.eup %992  ;;  %v1389_v16 = vmul.f32 %v492_v7, %v444_v6  ;;  %v495_v51 = vadd.f32 1.0, %v991_v10  ;;  %v448_v0 = vmul.f32 0.5, %v1325_v18  ;;  %v451_v10 = vmul.f32 0.5, %v1331_v20 }
  0xfa   : > { %v995_v17 = vpop.eup %994  ;;  %v599_v25 = vmul.f32 %v1275_v46, %v500_v45  ;;  %675 = vst [vmem:[%s1375_s30] sm:$0xff] %v500_v45  ;;  %v503_v26 = vmul.f32 %v487_v12, %v439_v11  ;;  %v486_v27 = vadd.f32 1.0, %v993_v15  ;;  %v638_v42 = vmul.f32 %v600_v47, %v600_v47 }
  0xfb   : > { %v997_v29 = vpop.eup %996  ;;  %683 = vst [vmem:[%s1375_s30 + $0x40] sm:$0xff] %v1389_v16  ;;  %v1397_v30 = vmul.f32 %v495_v51, %v447_v8  ;;  %v494_v31 = vadd.f32 1.0, %v995_v17  ;;  %v851_v20 = vsel %vm558_vm9, 1.0, %v1104_v43  ;;  %v607_v21 = vmul.f32 %v1291_v54, %v1389_v16 }
  0xfc   : > { %v999_v32 = vpop.eup %998  ;;  %v637_v33 = vmul.f32 %v599_v25, %v599_v25  ;;  %678 = vst [vmem:[%s1375_s30 + $0x18] sm:$0xff] %v503_v26  ;;  %v502_v46 = vmul.f32 %v486_v27, %v438_v50  ;;  %v489_v63 = vadd.f32 1.0, %v997_v29  ;;  %v615_v55 = vadd.f32 %v600_v47, %v599_v25 }
  0xfd   : > { %v1001_v40 = vpop.eup %1000  ;;  %686 = vst [vmem:[%s1375_s30 + $0x58] sm:$0xff] %v1397_v30  ;;  %v1406_v48 = vmul.f32 %v494_v31, %v446_v44  ;;  %v602_v56 = vmul.f32 %v1312_v5, %v503_v26  ;;  %v497_v4 = vadd.f32 1.0, %v999_v32  ;;  %v442_v50 = vmul.f32 0.5, %v1350_v36 }
  0xfe   : > { %v1003_v53 = vpop.eup %1002  ;;  %v601_v3 = vmul.f32 %v846_v28, %v502_v46  ;;  %677 = vst [vmem:[%s1375_s30 + $0x10] sm:$0xff] %v502_v46  ;;  %v653_v58 = vadd.f32 %v638_v42, %v637_v33  ;;  %v505_v59 = vmul.f32 %v489_v63, %v441_v39  ;;  %v488_v34 = vadd.f32 1.0, %v1001_v40 }
  0xff   : > { %v1005_v57 = vpop.eup %1004  ;;  %685 = vst [vmem:[%s1375_s30 + $0x50] sm:$0xff] %v1406_v48  ;;  %v1415_v6 = vmul.f32 %v497_v4, %v449_v62  ;;  %v496_v7 = vadd.f32 1.0, %v1003_v53  ;;  %v443_v28 = vmul.f32 0.5, %v1328_v19  ;;  %v640_v11 = vmul.f32 %v602_v56, %v602_v56 }
 0x100   : > { %v1007_v14 = vpop.eup %1006  ;;  %v616_v1 = vadd.f32 %v615_v55, %v601_v3  ;;  %v639_v2 = vmul.f32 %v601_v3, %v601_v3  ;;  %680 = vst [vmem:[%s1375_s30 + $0x28] sm:$0xff] %v505_v59  ;;  %v504_v5 = vmul.f32 %v488_v34, %v440_v49  ;;  %v491_v8 = vadd.f32 1.0, %v1005_v57 }
 0x101   : > { %v1009_v45 = vpop.eup %1008  ;;  %688 = vst [vmem:[%s1375_s30 + $0x68] sm:$0xff] %v1415_v6  ;;  %v1422_v15 = vmul.f32 %v496_v7, %v448_v0  ;;  %v604_v51 = vmul.f32 %v1366_v35, %v505_v59  ;;  %v499_v25 = vadd.f32 1.0, %v1007_v14  ;;  %v450_v36 = vmul.f32 0.5, %v1353_v38 }
 0x102   : > { %v654_v12 = vadd.f32 %v653_v58, %v639_v2  ;;  %v617_v18 = vadd.f32 %v616_v1, %v602_v56  ;;  %v1011_v47 = vpop.eup %1010  ;;  %v603_v17 = vmul.f32 %v848_v13, %v504_v5  ;;  %679 = vst [vmem:[%s1375_s30 + $0x20] sm:$0xff] %v504_v5  ;;  %v507_v19 = vmul.f32 %v491_v8, %v443_v28 }
 0x103   : > { %687 = vst [vmem:[%s1375_s30 + $0x60] sm:$0xff] %v1422_v15  ;;  %v490_v27 = vadd.f32 1.0, %v1009_v45  ;;  %v1435_v35 = vmul.f32 %v499_v25, %v451_v10  ;;  %v850_v13 = vsel %vm557_vm10, 1.0, %v1104_v43  ;;  %v498_v32 = vadd.f32 1.0, %v1011_v47 }
 0x104   : > { %v655_v26 = vadd.f32 %v654_v12, %v640_v11  ;;  %v618_v29 = vadd.f32 %v617_v18, %v603_v17  ;;  %v641_v44 = vmul.f32 %v603_v17, %v603_v17  ;;  %682 = vst [vmem:[%s1375_s30 + $0x38] sm:$0xff] %v507_v19  ;;  %v642_v33 = vmul.f32 %v604_v51, %v604_v51 }
 0x105   : > { %v506_v31 = vmul.f32 %v490_v27, %v442_v50  ;;  %690 = vst [vmem:[%s1375_s30 + $0x78] sm:$0xff] %v1435_v35  ;;  %v531_v62 = vadd.s32 112, %v1235_v22  ;;  %v606_v41 = vmul.f32 %v851_v20, %v507_v19  ;;  %v1457_v9 = vmul.f32 %v498_v32, %v450_v36 }
 0x106   : > { %v656_v46 = vadd.f32 %v655_v26, %v641_v44  ;;  %v619_v39 = vadd.f32 %v618_v29, %v604_v51  ;;  %v853_v40 = vsel %vm560_vm11, 1.0, %v1104_v43  ;;  %v548_v42 = vadd.s32 %v1241_v24, %v1340_v23 }
 0x107   : > { %v605_v38 = vmul.f32 %v850_v13, %v506_v31  ;;  %681 = vst [vmem:[%s1375_s30 + $0x30] sm:$0xff] %v506_v31  ;;  %v532_v63 = vadd.s32 120, %v1235_v22  ;;  %689 = vst [vmem:[%s1375_s30 + $0x70] sm:$0xff] %v1457_v9  ;;  %v549_v56 = vadd.s32 %v1241_v24, %v531_v62 }
 0x108   : > { %v657_v49 = vadd.f32 %v656_v46, %v642_v33 }
 0x109   : > { %v620_v53 = vadd.f32 %v619_v39, %v605_v38  ;;  %v643_v55 = vmul.f32 %v605_v38, %v605_v38 }
 0x10a   : > { %1025 = shalt.err (!%p1022_p3)
}
 0x10b   : > { %s1026_s20 = scalar_lea.hbm %s1451_s9, 2048  ;;  %s1030_s29 = scalar_lea.hbm %s1552_s3, 8192 }
 0x10c   : > { %p1027_p4 = scmp.ne.s32.totalorder %s1451_s9, %s1026_s20  ;;  %p1031_p9 = scmp.lt.s32.totalorder %s1451_s9, %s1552_s3 }
 0x10d   : > { %p1032_p10 = scmp.lt.s32.totalorder %s1030_s29, %s1026_s20 }
 0x10e   : > { %p1028_p7 = pnand %p1027_p4, %p1172_p5 }
 0x10f   : > { %p1033_p11 = por %p1032_p10, %p1031_p9 }
 0x110   : > { %p1029_p8 = pneg %p1028_p7 }
 0x112   : > { %p1034_p12 = pnand %p1033_p11, %p1029_p8 }
 0x114   : > { %1037 = shalt.err (!%p1034_p12)
}
 0x115   : > { %s1106_s7 = smov 128   ;;  %s1107_s8 = smov 8   ;;  %v608_v22 = vmul.f32 %v853_v40, %v1372_v61  ;;  %v644_v54 = vmul.f32 %v606_v41, %v606_v41  ;;  %v621_v23 = vadd.f32 %v620_v53, %v606_v41  ;;  %v658_v16 = vadd.f32 %v657_v49, %v643_v55 }
 0x116   : > { %933 = dma.vmem_to_hbm [thread:$0]  (%p1172_p5), %s1453_s6, 2048, %s1451_s9, %s692_s10, %s1106_s7, %s1106_s7, %s1107_s8   ;;  %v855_v3 = vsel %vm562_vm13, 1.0, %v1104_v43  ;;  %vm564_vm15 = vcmp.lt.s32.totalorder %v548_v42, 512  ;;  %v550_v4 = vadd.s32 %v1241_v24, %v532_v63  ;;  %v645_v57 = vmul.f32 %v607_v21, %v607_v21 }
 0x117   : > { %v609_v58 = vmul.f32 %v854_v37, %v1406_v48  ;;  %v622_v59 = vadd.f32 %v621_v23, %v607_v21  ;;  %v659_v34 = vadd.f32 %v658_v16, %v644_v54  ;;  %v856_v0 = vsel %vm563_vm14, 1.0, %v1104_v43  ;;  %s822_s6 = sshll.u32 %s1334_s28, 3  ;;  %s724_s13 = scalar_lea.hbm %s1553_s4, %s843_s22 }
 0x118   : > { %vm565_vm0 = vcmp.lt.s32.totalorder %v549_v56, 512  ;;  %v646_v61 = vmul.f32 %v608_v22, %v608_v22  ;;  %v610_v14 = vmul.f32 %v855_v3, %v1397_v30  ;;  %v857_v52 = vsel %vm564_vm15, 1.0, %v1104_v43  ;;  %s202_s9 = scalar_lea.vmem [#allocation4], %s822_s6  ;;  %s697_s14 = scalar_lea.sflag [#allocation5], %s1334_s28 }
 0x119   : > { %v623_v1 = vadd.f32 %v622_v59, %v608_v22  ;;  %v660_v2 = vadd.f32 %v659_v34, %v645_v57  ;;  %vm566_vm1 = vcmp.lt.s32.totalorder %v550_v4, 512  ;;  %v647_v7 = vmul.f32 %v609_v58, %v609_v58  ;;  %s726_s10 = sshll.u32 %s202_s9, 4  ;;  %s1108_s23 = smov [#allocation4]   ;;  %s727_s10 = int_to_ptr.vmem [resolvable:$true] %s726_s10 }
 0x11a   : > { %v611_v24 = vmul.f32 %v856_v0, %v1422_v15  ;;  %v858_v28 = vsel %vm565_vm0, 1.0, %v1104_v43  ;;  %v648_v8 = vmul.f32 %v610_v14, %v610_v14  ;;  %v612_v10 = vmul.f32 %v857_v52, %v1415_v6  ;;  %s1038_s20 = scalar_lea.vmem %s727_s10, 128  ;;  %s1042_s27 = sshll.u32 %s1108_s23, 4  ;;  %s1043_s27 = int_to_ptr.vmem [resolvable:$false] %s1042_s27 }
 0x11b   : > { %v661_v5 = vadd.f32 %v660_v2, %v646_v61  ;;  %v624_v48 = vadd.f32 %v623_v1, %v609_v58  ;;  %v859_v12 = vsel %vm566_vm1, 1.0, %v1104_v43  ;;  %v613_v18 = vmul.f32 %v858_v28, %v1457_v9  ;;  %p1039_p13 = scmp.ne.s32.totalorder %s727_s10, %s1038_s20  ;;  %s1044_s29 = scalar_lea.vmem %s1043_s27, 256 }
 0x11c   : > { %v649_v30 = vmul.f32 %v611_v24, %v611_v24  ;;  %v650_v17 = vmul.f32 %v612_v10, %v612_v10  ;;  %v614_v15 = vmul.f32 %v859_v12, %v1435_v35  ;;  %p1045_p2 = scmp.lt.s32.totalorder %s727_s10, %s1043_s27  ;;  %p1046_p3 = scmp.lt.s32.totalorder %s1044_s29, %s1038_s20 }
 0x11d   : > { %v625_v45 = vadd.f32 %v624_v48, %v610_v14  ;;  %v662_v11 = vadd.f32 %v661_v5, %v647_v7  ;;  %v651_v20 = vmul.f32 %v613_v18, %v613_v18  ;;  %p1040_p0 = pnand %p1039_p13, %p1172_p5 }
 0x11e   : > { %v652_v27 = vmul.f32 %v614_v15, %v614_v15  ;;  %p1047_p4 = por %p1046_p3, %p1045_p2 }
 0x11f   : > { %v626_v47 = vadd.f32 %v625_v45, %v611_v24  ;;  %v663_v51 = vadd.f32 %v662_v11, %v648_v8  ;;  %p1041_p1 = pneg %p1040_p0 }
 0x121   : > { %v627_v19 = vadd.f32 %v626_v47, %v612_v10  ;;  %v664_v25 = vadd.f32 %v663_v51, %v649_v30  ;;  %p1048_p7 = pnand %p1047_p4, %p1041_p1 }
 0x123   : > { %v628_v26 = vadd.f32 %v627_v19, %v613_v18  ;;  %v665_v50 = vadd.f32 %v664_v25, %v650_v17 }
 0x125   : > { %v629_v6 = vadd.f32 %v628_v26, %v614_v15  ;;  %v666_v29 = vadd.f32 %v665_v50, %v651_v20 }
 0x127   : > { %v630_v44 = vrot.slane %v629_v6, 4  ;;  %v667_v13 = vadd.f32 %v666_v29, %v652_v27 }
 0x129   : > { %v631_v43 = vadd.f32 %v630_v44, %v629_v6  ;;  %v668_v60 = vrot.slane %v667_v13, 4 }
 0x12b   : > { %v632_v31 = vrot.slane %v631_v43, 2  ;;  %v669_v36 = vadd.f32 %v668_v60, %v667_v13 }
 0x12d   : > { %v633_v32 = vadd.f32 %v632_v31, %v631_v43  ;;  %v670_v35 = vrot.slane %v669_v36, 2 }
 0x12f   : > { %v634_v33 = vrot.slane %v633_v32, 1  ;;  %v671_v46 = vadd.f32 %v670_v35, %v669_v36 }
 0x131   : > { %v635_v39 = vadd.f32 %v634_v33, %v633_v32  ;;  %v672_v62 = vrot.slane %v671_v46, 1 }
 0x133   : > { %636 = vst [vmem:[%s202_s9] sm:$0x1] %v635_v39  ;;  %v673_v41 = vadd.f32 %v672_v62, %v671_v46 }
 0x135   : > { %674 = vst [vmem:[%s202_s9 + $0x1] sm:$0x1] %v673_v41 }
 0x136   : > { %1051 = shalt.err (!%p1048_p7)
}
 0x137   : > { %s1052_s19 = scalar_lea.hbm %s724_s13, 128  ;;  %s1056_s30 = scalar_lea.hbm %s1553_s4, 512 }
 0x138   : > { %p1053_p8 = scmp.ne.s32.totalorder %s724_s13, %s1052_s19  ;;  %p1057_p11 = scmp.lt.s32.totalorder %s724_s13, %s1553_s4 }
 0x139   : > { %p1058_p12 = scmp.lt.s32.totalorder %s1056_s30, %s1052_s19 }
 0x13a   : > { %p1054_p9 = pnand %p1053_p8, %p1172_p5 }
 0x13b   : > { %p1059_p13 = por %p1058_p12, %p1057_p11 }
 0x13c   : > { %p1055_p10 = pneg %p1054_p9 }
 0x13e   : > { %p1060_p0 = pnand %p1059_p13, %p1055_p10 }
 0x140   : > { %1063 = shalt.err (!%p1060_p0)
}
 0x141   : > { %934 = dma.vmem_to_hbm [thread:$0]  (%p1172_p5), %s727_s10, 128, %s724_s13, %s697_s14  }
 0x142 PF: > { %p944_p1 = scmp.ge.s32.totalorder %s1102_s18, 2  ;;  %s738_s8 = sand.u32 1, %s1090_s15  }
 0x143   : > { %s739_s6 = scalar_lea.sflag [#allocation3], %s738_s8 }
 0x144   : > { %p938_p2 = pnand %p944_p1, %p1176_p6 }
 0x146   : > { %p939_p3 = pneg %p938_p2 }
 0x148   : > { %1081 = dma.done.wait (%p939_p3), %s739_s6, 2048  }
 0x149   : > { %1083 = vsyncadd (%p939_p3), %s739_s6, 4294965248  ;;  %s748_s9 = scalar_lea.sflag [#allocation5], %s738_s8 }
 0x14a   : > { %1085 = dma.done.wait (%p939_p3), %s748_s9, 128  }
 0x14b   : > { %1087 = vsyncadd (%p939_p3), %s748_s9, 4294967168  ;;  %p18_p5 = scmp.ge.s32.totalorder %s1159_s21, 6   ;;  %s1556_s15 = smov %s1094_s16 }
 0x14c   : > { %s1557_s16 = smov %s1098_s17  ;;  %s1558_s17 = smov %s1170_s24 }
 0x14d   : > { %s1559_s18 = smov %s1159_s21  ;;  %20 = sbr.rel (!%p18_p5) target bundleno = 5 (0x5), region = 84 }
 0x152   :  { %753 = vsyncpa [#allocation3], 1 }
 0x153   :  { %755 = vsyncpa [#allocation3 + $0x1], 1 }
 0x154   :  { %756 = vsyncpa [#allocation5], 1 }
 0x155   :  { %758 = vsyncpa [#allocation5 + $0x1], 1 }

</bundles_post_ra>
